<compile_context>
chip_gen: v6e
topology: v6e:2x2x1
jax: 0.10.0
libtpu: 0.0.40
codegen_flags: <defaults>
</compile_context>

<pallas_src>
import math

import jax
import jax.numpy as jnp
from jax.experimental import pallas as pl
from jax.experimental.pallas import tpu as pltpu


_PREFERRED_LANE_WIDTHS = (512, 256, 128)
_MAX_DMA_CHUNKS = 8            # DMA semaphores kept in flight
_MIN_CHUNK_BYTES = 512 * 1024  # don't split below ~0.5 MiB per chunk


def _resolve_shape(numel, shape):
    """Mimic torch.reshape shape resolution, including a single -1 entry."""
    shape = tuple(int(s) for s in shape)
    if shape.count(-1) > 1:
        raise ValueError("only one dimension can be -1")
    if -1 in shape:
        known = 1
        for s in shape:
            if s != -1:
                known *= s
        if known == 0 or numel % known != 0:
            raise ValueError(f"cannot reshape {numel} elements into {shape}")
        shape = tuple(numel // known if s == -1 else s for s in shape)
    if math.prod(shape) != numel:
        raise ValueError(f"cannot reshape {numel} elements into {shape}")
    return shape


def _work_view(x, numel):
    """Pick the array view whose leading axis the DMA chunks slice."""
    if x.ndim == 0:
        return jnp.reshape(x, (1,))
    for lanes in _PREFERRED_LANE_WIDTHS:
        if numel >= lanes and numel % lanes == 0:
            # Metadata-only view of the contiguous buffer — lane-dense 2-D.
            return jnp.reshape(x, (numel // lanes, lanes))
    # Odd element count: copy the original contiguous buffer as-is.
    return x


def _plan_chunks(leading, total_bytes, min_chunk_bytes):
    """Static (start, size) chunks along the leading axis (no divisibility
    requirement — the last chunk just takes the remainder)."""
    n = max(1, min(_MAX_DMA_CHUNKS,
                   total_bytes // max(1, min_chunk_bytes),
                   leading))
    per = -(-leading // n)  # ceil-div
    chunks = []
    start = 0
    while start < leading:
        size = min(per, leading - start)
        chunks.append((start, size))
        start += size
    return chunks


def _make_dma_copy_kernel(chunks):
    def kernel(x_hbm, o_hbm, sems):
        copies = [
            pltpu.make_async_copy(
                x_hbm.at[pl.ds(start, size)],
                o_hbm.at[pl.ds(start, size)],
                sems.at[i],
            )
            for i, (start, size) in enumerate(chunks)
        ]
        for cp in copies:   # issue all DMAs — kept in flight simultaneously
            cp.start()
        for cp in copies:   # then drain
            cp.wait()
    return kernel


def _pallas_hbm_copy(work, chunks):
    nbytes = math.prod(work.shape) * jnp.dtype(work.dtype).itemsize
    return pl.pallas_call(
        _make_dma_copy_kernel(chunks),
        out_shape=jax.ShapeDtypeStruct(work.shape, work.dtype),
        in_specs=[pl.BlockSpec(memory_space=pl.ANY)],
        out_specs=pl.BlockSpec(memory_space=pl.ANY),
        scratch_shapes=[pltpu.SemaphoreType.DMA((len(chunks),))],
        cost_estimate=pl.CostEstimate(
            flops=0, transcendentals=0, bytes_accessed=2 * nbytes),
    )(work)


def reshape_layer(x, shape, *, force_pallas_copy=False,
                  min_chunk_bytes=_MIN_CHUNK_BYTES):
    """Pallas/JAX implementation of ReshapeLayer(shape)(x)."""
    numel = math.prod(x.shape) if x.shape else 1
    target_shape = _resolve_shape(numel, shape)

    if not force_pallas_copy or numel == 0:
        # Fast path: reshape of a contiguous row-major buffer is metadata-only
        # (zero HBM traffic).  Row-major order matches torch.reshape exactly.
        return jnp.reshape(x, target_shape)

    work = _work_view(x, numel)
    total_bytes = numel * jnp.dtype(x.dtype).itemsize
    chunks = _plan_chunks(work.shape[0], total_bytes, min_chunk_bytes)
    out = _pallas_hbm_copy(work, chunks)
    return jnp.reshape(out, target_shape)


class ReshapeLayer:
    """JAX/Pallas equivalent of the PyTorch ReshapeLayer module (no params)."""

    def __init__(self, shape, force_pallas_copy=False):
        self.shape = shape
        self.force_pallas_copy = force_pallas_copy

    def __call__(self, layer):
        return reshape_layer(layer, self.shape,
                             force_pallas_copy=self.force_pallas_copy)


if __name__ == "__main__":
    key = jax.random.PRNGKey(0)
    k1, k2, k3, k4 = jax.random.split(key, 4)

    # 1) Default fast path (recommended): metadata-only reshape.
    x = jax.random.normal(k1, (2, 4, 16, 16), dtype=jnp.float32)
    layer = ReshapeLayer((2, -1))
    out = jax.block_until_ready(layer(x))
    ref = jnp.reshape(x, (2, -1))
    assert out.shape == ref.shape == (2, 1024), out.shape
    assert out.dtype == x.dtype
    assert bool(jnp.array_equal(out, ref))

    # 2) Forced HBM->HBM DMA copy on the same small input (single chunk).
    out_p = jax.block_until_ready(
        reshape_layer(x, (2, -1), force_pallas_copy=True))
    assert out_p.shape == (2, 1024) and out_p.dtype == x.dtype
    assert bool(jnp.array_equal(out_p, ref))

    # 3) Forced copy with multiple DMA chunks in flight (512 KiB / 64 KiB = 8).
    x2 = jax.random.normal(k2, (8, 16, 32, 32), dtype=jnp.float32)
    out2 = jax.block_until_ready(
        reshape_layer(x2, (8, -1), force_pallas_copy=True,
                      min_chunk_bytes=64 * 1024))
    assert bool(jnp.array_equal(out2, jnp.reshape(x2, (8, -1))))

    # 4) bf16 input.
    x3 = jax.random.normal(k3, (2, 8, 32, 32), dtype=jnp.bfloat16)
    out3 = jax.block_until_ready(
        reshape_layer(x3, (-1, 128), force_pallas_copy=True))
    assert out3.dtype == jnp.bfloat16
    assert bool(jnp.array_equal(out3, jnp.reshape(x3, (-1, 128))))

    # 5) Odd element count (105 elems): whole-buffer DMA, no silent fallback.
    x4 = jax.random.normal(k4, (3, 5, 7), dtype=jnp.float32)
    out4 = jax.block_until_ready(
        reshape_layer(x4, (105,), force_pallas_copy=True))
    assert bool(jnp.array_equal(out4, jnp.reshape(x4, (105,))))

    print("KERNEL_OK")
</pallas_src>

<mosaic_0001>
module attributes {stable_mosaic.version = 11 : i64} {
  func.func @kernel(%arg0: memref<4x512xf32, #tpu.memory_space<any>>, %arg1: memref<4x512xf32, #tpu.memory_space<any>>, %arg2: memref<1x!tpu.dma_semaphore, #tpu.memory_space<semaphore_mem>>) attributes {dimension_semantics = [], scalar_prefetch = 0 : i64, scratch_operands = 1 : i64, tpu.core_type = #tpu.core_type<tc>} {
    %c0_i32 = arith.constant 0 : i32
    %c0_i32_0 = arith.constant 0 : i32
    %c0_i32_1 = arith.constant 0 : i32
    %0 = tpu.memref_slice %arg0[%c0_i32_0, %c0_i32_1] : memref<4x512xf32, #tpu.memory_space<any>> -> memref<4x512xf32, #tpu.memory_space<any>>
    %c0_i32_2 = arith.constant 0 : i32
    %c0_i32_3 = arith.constant 0 : i32
    %1 = tpu.memref_slice %arg1[%c0_i32_2, %c0_i32_3] : memref<4x512xf32, #tpu.memory_space<any>> -> memref<4x512xf32, #tpu.memory_space<any>>
    %2 = tpu.memref_slice %arg2[%c0_i32] : memref<1x!tpu.dma_semaphore, #tpu.memory_space<semaphore_mem>> -> memref<1x!tpu.dma_semaphore, #tpu.memory_space<semaphore_mem>>
    %3 = tpu.memref_squeeze %2 : memref<1x!tpu.dma_semaphore, #tpu.memory_space<semaphore_mem>> -> memref<!tpu.dma_semaphore, #tpu.memory_space<semaphore_mem>>
    tpu.enqueue_dma source(%0 : memref<4x512xf32, #tpu.memory_space<any>>) target(%1 : memref<4x512xf32, #tpu.memory_space<any>>) target_semaphore(%3 : memref<!tpu.dma_semaphore, #tpu.memory_space<semaphore_mem>>)
    %c0_i32_4 = arith.constant 0 : i32
    %c0_i32_5 = arith.constant 0 : i32
    %c0_i32_6 = arith.constant 0 : i32
    %4 = tpu.memref_slice %arg0[%c0_i32_5, %c0_i32_6] : memref<4x512xf32, #tpu.memory_space<any>> -> memref<4x512xf32, #tpu.memory_space<any>>
    %c0_i32_7 = arith.constant 0 : i32
    %c0_i32_8 = arith.constant 0 : i32
    %5 = tpu.memref_slice %arg1[%c0_i32_7, %c0_i32_8] : memref<4x512xf32, #tpu.memory_space<any>> -> memref<4x512xf32, #tpu.memory_space<any>>
    %6 = tpu.memref_slice %arg2[%c0_i32_4] : memref<1x!tpu.dma_semaphore, #tpu.memory_space<semaphore_mem>> -> memref<1x!tpu.dma_semaphore, #tpu.memory_space<semaphore_mem>>
    %7 = tpu.memref_squeeze %6 : memref<1x!tpu.dma_semaphore, #tpu.memory_space<semaphore_mem>> -> memref<!tpu.dma_semaphore, #tpu.memory_space<semaphore_mem>>
    tpu.wait_dma2 semaphore(%7 : memref<!tpu.dma_semaphore, #tpu.memory_space<semaphore_mem>>) src(%4 : memref<4x512xf32, #tpu.memory_space<any>>) dst(%5 : memref<4x512xf32, #tpu.memory_space<any>>)
    return
  }
}

</mosaic_0001>

<bundles_post_ra>
// kernel: tpu_custom_call.1
= control target key start
LH: loop header
LB: loop body
LE: loop exit
PB: predicated region body
PF: predicated region fallthrough
CT: control target
= control target key end

     0   :  { %s29_s6 = smov [#allocation2]   ;;  %s30_s7 = smov 131072   ;;  %s48_s0 = inlined_call_operand.hbm [shape: f32[4,512], index: 0, kind: input, shape index: {}]   ;;  %s49_s1 = inlined_call_operand.hbm [shape: f32[4,512], index: 1, kind: output, shape index: {}]  }
   0x1   :  { %s31_s8 = smov 0  }
   0x2   :  { %12 = dma.general %s48_s0, 256, %s49_s1, %s29_s6, %s30_s7, [#allocation4], %s31_s8, 0  }
   0x3   :  { %27 = dma.done.wait [#allocation2], 256 }
   0x4   :  { %28 = vsyncadd [#allocation2], 4294967040 }
   0x5   :  { %17 = vsyncmov [#allocation2] }
   0x8   :  { %s18_s13 = vpop.sfrf %17 }
   0x9   :  { %p23_p0 = scmp.ne.s32.totalorder %s18_s13, 0 }
   0xb   :  { %22 = shalt.err (%p23_p0)  }

</bundles_post_ra>
